<compile_context>
chip_gen: v7x
topology: tpu7x:2x2x1
jax: 0.10.0
libtpu: 0.0.40
codegen_flags: <defaults>
</compile_context>

<pallas_src>
import jax
import jax.numpy as jnp
from jax import lax
from jax.experimental import pallas as pl
from jax.experimental.pallas import tpu as pltpu

_MIB = 1024 * 1024
_ISSUE_UNROLL = 8  # manual partial unroll of the DMA-issue loop


def _vmem_capacity_bytes():
    """Physical VMEM capacity (64 MiB on v7x, 128 MiB on v5e/v6e)."""
    try:
        return int(pltpu.get_tpu_info().vmem_capacity_bytes)
    except Exception:
        return 64 * _MIB  # conservative (v7x-sized) fallback


def _round_up(x, m):
    return ((x + m - 1) // m) * m


def _pad_token_axis(T, tile):
    """Pad the flattened token count to whole tiles; when there is more than
    one grid step, pad to an even number of steps so megacore sharding on
    v7x balances both TensorCores."""
    T_pad = _round_up(T, tile)
    n = T_pad // tile
    if n > 1 and n % 2 == 1:
        T_pad += tile
    return T_pad


# ----------------------------------------------------------------------------
# Fast path: table resident in VMEM, gather via one-hot MXU matmul.
# ----------------------------------------------------------------------------
def _onehot_gather_kernel(ids_ref, w_ref, out_ref):
    """ids_ref: (tile, 1) int32 VMEM; w_ref: (voc, emb) VMEM; out_ref: (tile, emb)."""
    voc = w_ref.shape[0]
    ids = ids_ref[...]                                      # (tile, 1)
    cols = lax.broadcasted_iota(jnp.int32, (1, voc), 1)     # (1, voc)
    onehot = (ids == cols).astype(w_ref.dtype)              # (tile, voc), exact 0/1
    out_ref[...] = jnp.dot(
        onehot, w_ref[...], preferred_element_type=jnp.float32
    ).astype(out_ref.dtype)


def _fast_path(ids_flat, weight, token_tile, vmem_limit):
    T = ids_flat.shape[0]
    voc, emb = weight.shape

    tile = max(8, _round_up(min(token_tile, _round_up(T, 8)), 8))
    T_pad = _pad_token_axis(T, tile)
    ids2 = jnp.pad(ids_flat, (0, T_pad - T)).reshape(T_pad, 1)

    out = pl.pallas_call(
        _onehot_gather_kernel,
        out_shape=jax.ShapeDtypeStruct((T_pad, emb), weight.dtype),
        grid=(T_pad // tile,),
        in_specs=[
            pl.BlockSpec((tile, 1), lambda i: (i, 0)),      # ids tile
            pl.BlockSpec((voc, emb), lambda i: (0, 0)),     # full table, VMEM resident
        ],
        out_specs=pl.BlockSpec((tile, emb), lambda i: (i, 0)),
        compiler_params=pltpu.CompilerParams(
            dimension_semantics=("parallel",),
            vmem_limit_bytes=vmem_limit,
        ),
    )(ids2, weight)
    return out[:T]


# ----------------------------------------------------------------------------
# Slow path: table stays in HBM, per-row DMAs into the pipelined output block.
# ----------------------------------------------------------------------------
def _hbm_row_gather_kernel(ids_ref, w_hbm, out_ref, copy_sem):
    """ids_ref : (T_pad,) int32 all token ids (SMEM, scalar-prefetched)
    w_hbm    : (voc, emb_p) embedding table left in HBM (pl.ANY)
    out_ref  : (tile, emb_p) output block in VMEM (DMA destination)
    copy_sem : (1,) DMA semaphore shared by all row copies of this step
    """
    tile = out_ref.shape[0]
    base = pl.program_id(0) * tile
    sem = copy_sem.at[0]

    # Issue all row DMAs back-to-back (manual partial unroll so the scheduler
    # packs SMEM id loads with DMA-descriptor pushes; no waits in between).
    def issue_group(g, carry):
        t0 = pl.multiple_of(g * _ISSUE_UNROLL, _ISSUE_UNROLL)
        for u in range(_ISSUE_UNROLL):
            t = t0 + u
            row = ids_ref[base + t]
            pltpu.make_async_copy(w_hbm.at[row], out_ref.at[t], sem).start()
        return carry

    lax.fori_loop(0, tile // _ISSUE_UNROLL, issue_group, 0)

    # ONE aggregate wait: every row copy signals the same semaphore with an
    # identical byte count, so a single (tile, emb_p)-sized wait consumes the
    # whole tile's completion count (replaces `tile` scalar waits).
    pltpu.make_async_copy(w_hbm.at[pl.ds(0, tile)], out_ref, sem).wait()


def _hbm_path(ids_flat, weight, token_tile, vmem_limit):
    T = ids_flat.shape[0]
    voc, emb = weight.shape
    orig_dtype = weight.dtype
    itemsize = jnp.dtype(orig_dtype).itemsize

    # Pack sub-32-bit rows (e.g. bf16) into uint32 so each small row DMA
    # writes whole 32-bit words on the VMEM side (no packed-sublane handling).
    per = 1
    if itemsize < 4 and (emb * itemsize) % 4 == 0:
        per = 4 // itemsize
        weight = lax.bitcast_convert_type(
            weight.reshape(voc, emb // per, per), jnp.uint32)
    emb_p = weight.shape[1]

    tile = max(8, _round_up(min(token_tile, _round_up(T, 8)), 8))
    T_pad = _pad_token_axis(T, tile)
    ids_pad = jnp.pad(ids_flat, (0, T_pad - T))

    out = pl.pallas_call(
        _hbm_row_gather_kernel,
        out_shape=jax.ShapeDtypeStruct((T_pad, emb_p), weight.dtype),
        grid_spec=pltpu.PrefetchScalarGridSpec(
            num_scalar_prefetch=1,                          # ids -> SMEM
            grid=(T_pad // tile,),
            in_specs=[pl.BlockSpec(memory_space=pl.ANY)],   # table stays in HBM
            out_specs=pl.BlockSpec((tile, emb_p), lambda i, ids: (i, 0)),
            scratch_shapes=[pltpu.SemaphoreType.DMA((1,))],
        ),
        compiler_params=pltpu.CompilerParams(
            dimension_semantics=("parallel",),              # megacore on v7x
            vmem_limit_bytes=vmem_limit,
        ),
    )(ids_pad, weight)

    out = out[:T]
    if per > 1:
        out = lax.bitcast_convert_type(out, orig_dtype).reshape(T, emb)
    return out


# ----------------------------------------------------------------------------
# Public wrapper: BasicEmbeddings.forward (dropoute == 0).
# ----------------------------------------------------------------------------
def basic_embeddings_forward(input_ids, weight, *, token_tile=512,
                             force_hbm_gather=False):
    """input_ids: (seq_length, batch_size) int ids; weight: (voc, emb) table.
    Returns (seq_length, batch_size, emb) with weight's dtype."""
    seq_len, batch = input_ids.shape
    voc, emb = weight.shape
    T = seq_len * batch

    # Clamp like jnp.take (torch.nn.Embedding would raise on out-of-range ids).
    ids_flat = jnp.clip(input_ids.reshape(T).astype(jnp.int32), 0, voc - 1)

    cap = _vmem_capacity_bytes()
    vmem_limit = min((cap * 3) // 4, 96 * _MIB)  # 48 MiB on v7x, 96 MiB on v5e/v6e
    table_bytes = voc * emb * jnp.dtype(weight.dtype).itemsize

    # VMEM-resident fast path when the (double-buffered) table comfortably
    # fits and the one-hot intermediate stays small.
    use_fast = (not force_hbm_gather
                and table_bytes <= cap // 4
                and voc <= 2048)

    if use_fast:
        out_flat = _fast_path(ids_flat, weight, token_tile, vmem_limit)
    else:
        out_flat = _hbm_path(ids_flat, weight, token_tile, vmem_limit)

    return out_flat.reshape(seq_len, batch, emb)


if __name__ == "__main__":
    key = jax.random.PRNGKey(0)
    k_w, k_ids, k_w2, k_ids2 = jax.random.split(key, 4)

    initrange = 0.1
    seq_len, batch = 8, 2

    # ---- Test 1: module-sized config -> VMEM-resident one-hot fast path ----
    voc_sz, emb_sz, pad_idx = 64, 32, 0
    # encoder.weight.data.uniform_(-initrange, initrange)
    weight = jax.random.uniform(
        k_w, (voc_sz, emb_sz), dtype=jnp.float32,
        minval=-initrange, maxval=initrange)
    input_ids = jax.random.randint(
        k_ids, (seq_len, batch), minval=0, maxval=voc_sz, dtype=jnp.int32)

    out = jax.block_until_ready(basic_embeddings_forward(input_ids, weight))
    ref = jnp.take(weight, input_ids, axis=0)
    assert out.shape == (seq_len, batch, emb_sz)
    assert jnp.allclose(out, ref), "fast-path embedding lookup mismatch"

    # ---- Test 2: force the HBM row-DMA gather path (bf16, u32-packed rows) --
    voc2, emb2 = 256, 128
    weight2 = jax.random.uniform(
        k_w2, (voc2, emb2), dtype=jnp.float32,
        minval=-initrange, maxval=initrange).astype(jnp.bfloat16)
    input_ids2 = jax.random.randint(
        k_ids2, (seq_len, batch), minval=0, maxval=voc2, dtype=jnp.int32)

    out2 = jax.block_until_ready(
        basic_embeddings_forward(input_ids2, weight2, force_hbm_gather=True))
    ref2 = jnp.take(weight2, input_ids2, axis=0)
    assert out2.shape == (seq_len, batch, emb2)
    assert jnp.array_equal(out2, ref2), "HBM row-gather mismatch"

    print("KERNEL_OK")
</pallas_src>

<mosaic_0001>
module attributes {stable_mosaic.version = 11 : i64} {
  func.func @_onehot_gather_kernel(%arg0: i32, %arg1: memref<16x1xi32, #tpu.memory_space<vmem>>, %arg2: memref<64x32xf32, #tpu.memory_space<vmem>>, %arg3: memref<16x32xf32, #tpu.memory_space<vmem>>) attributes {dimension_semantics = [#tpu.dimension_semantics<parallel>], iteration_bounds = array<i64: 1>, scalar_prefetch = 0 : i64, scratch_operands = 0 : i64, tpu.core_type = #tpu.core_type<tc>, window_params = [{transform_indices = @transform_0, window_bounds = array<i64: 16, 1>}, {pipeline_mode = #tpu.pipeline_mode<synchronous>, transform_indices = @transform_1, window_bounds = array<i64: 64, 32>}, {transform_indices = @transform_2, window_bounds = array<i64: 16, 32>}]} {
    %c0 = arith.constant 0 : index
    %c0_0 = arith.constant 0 : index
    %0 = vector.load %arg1[%c0, %c0_0] : memref<16x1xi32, #tpu.memory_space<vmem>>, vector<16x1xi32>
    %1 = tpu.iota {dimensions = array<i32: 1>} : vector<1x64xi32>
    %2 = vector.broadcast %0 : vector<16x1xi32> to vector<16x64xi32>
    %3 = vector.broadcast %1 : vector<1x64xi32> to vector<16x64xi32>
    %4 = arith.cmpi eq, %2, %3 : vector<16x64xi32>
    %5 = arith.extui %4 : vector<16x64xi1> to vector<16x64xi32>
    %6 = arith.sitofp %5 : vector<16x64xi32> to vector<16x64xf32>
    %c0_1 = arith.constant 0 : index
    %c0_2 = arith.constant 0 : index
    %7 = vector.load %arg2[%c0_1, %c0_2] : memref<64x32xf32, #tpu.memory_space<vmem>>, vector<64x32xf32>
    %cst = arith.constant dense<0.000000e+00> : vector<16x32xf32>
    %8 = tpu.matmul %6, %7, %cst {dimension_numbers = #tpu.dot_dimension_numbers<[1], [0], [0], [1], [0, 0, 1, 1], [], []>} : vector<16x64xf32>, vector<64x32xf32>, vector<16x32xf32> -> vector<16x32xf32>
    %c0_3 = arith.constant 0 : index
    %c0_4 = arith.constant 0 : index
    %9 = vector.load %arg3[%c0_3, %c0_4] : memref<16x32xf32, #tpu.memory_space<vmem>>, vector<16x32xf32>
    tpu.vector_store %arg3[%c0_3, %c0_4], %8 {strides = array<i32>} : memref<16x32xf32, #tpu.memory_space<vmem>>, vector<16x32xf32>,
    return
  }
  func.func @transform_0(%arg0: i32) -> (i32, i32) {
    %c0_i32 = arith.constant 0 : i32
    %c0_i32_0 = arith.constant 0 : i32
    return %arg0, %c0_i32 : i32, i32
  }
  func.func @transform_1(%arg0: i32) -> (i32, i32) {
    %c0_i32 = arith.constant 0 : i32
    %c0_i32_0 = arith.constant 0 : i32
    %c0_i32_1 = arith.constant 0 : i32
    return %c0_i32, %c0_i32_0 : i32, i32
  }
  func.func @transform_2(%arg0: i32) -> (i32, i32) {
    %c0_i32 = arith.constant 0 : i32
    %c0_i32_0 = arith.constant 0 : i32
    return %arg0, %c0_i32 : i32, i32
  }
}

</mosaic_0001>

<bundles_post_ra>
// kernel: tpu_custom_call.1
= control target key start
LH: loop header
LB: loop body
LE: loop exit
PB: predicated region body
PF: predicated region fallthrough
CT: control target
= control target key end

     0   :  { %v216_v2 = vmov 0   ;;  %s278_s0 = inlined_call_operand.vmem [shape: s32[16,1], index: 0, kind: input, shape index: {}]   ;;  %s279_s1 = inlined_call_operand.vmem [shape: f32[64,32], index: 1, kind: input, shape index: {}]   ;;  %s280_s2 = inlined_call_operand.hbm [shape: f32[16,32], index: 2, kind: output, shape index: {}]  }
   0x1   :  { %v12_v0 = vld [vmem:[%s278_s0] sm:$0xff]  ;;  %191 = vset.pattern.permute.xlu0 %v216_v2  ;;  %v29_v3 = vld [vmem:[%s279_s1 + $0x8] sm:$0xff]  ;;  %v30_v4 = vld [vmem:[%s279_s1 + $0x10] sm:$0xff] }
   0x2   :  { %v28_v1 = vld [vmem:[%s279_s1] sm:$0xff]  ;;  %v31_v5 = vld [vmem:[%s279_s1 + $0x18] sm:$0xff]  ;;  %17 = vperm.xlu0 %191, %v12_v0   ;;  %v13_v6 = vld [vmem:[%s278_s0 + $0x8] sm:$0xff] }
   0x3   :  { %v170_v7 = vpack.c.bf16 %v29_v3, %v28_v1  ;;  %v174_v8 = vpack.c.bf16 %v31_v5, %v30_v4  ;;  %v32_v9 = vld [vmem:[%s279_s1 + $0x20] sm:$0xff]  ;;  %v33_v10 = vld [vmem:[%s279_s1 + $0x28] sm:$0xff] }
   0x4   :  { %7 = vsyncpa [#allocation3], 0  ;;  %v178_v11 = vpack.c.bf16 %v33_v10, %v32_v9  ;;  %v34_v12 = vld [vmem:[%s279_s1 + $0x30] sm:$0xff]  ;;  %v35_v13 = vld [vmem:[%s279_s1 + $0x38] sm:$0xff]  ;;  %v14_v15 = vlaneseq  ;;  %vm36_vm0 = vcmask 523264   ;;  %v217_v18 = vmov 0.0  }
   0x5   :  { %171 = vmatprep.subr.bf16.mxu0 %v170_v7  ;;  %v182_v14 = vpack.c.bf16 %v35_v13, %v34_v12  ;;  %s218_s28 = smov [#allocation2]   ;;  %vm118_vm3 = vcmask 261120  }
   0x6   :  { %173 = vmatpush3.bf16.msra.mxu0 %v170_v7  ;;  %20 = vperm.xlu0 %191, %v13_v6   ;;  %v15_v16 = vand.u32 127, %v14_v15  ;;  %s126_s1 = sshll.u32 %s218_s28, 4  ;;  %s127_s1 = int_to_ptr.vmem [resolvable:$true] %s126_s1 }
   0x7   :  { %175 = vmatprep.subr.bf16.mxu0 %v174_v8  ;;  %s192_s29 = scalar_lea.vmem %s127_s1, 256  ;;  %p197_p1 = scmp.lt.s32.totalorder %s127_s1, %s127_s1 }
   0x8   :  { %p193_p0 = scmp.ne.s32.totalorder %s127_s1, %s192_s29  ;;  %p198_p2 = scmp.lt.s32.totalorder %s192_s29, %s192_s29 }
   0xa   :  { %177 = vmatpush3.bf16.msra.mxu0 %v174_v8  ;;  %p199_p3 = por %p198_p2, %p197_p1 }
   0xb   :  { %179 = vmatprep.subr.bf16.mxu0 %v178_v11 }
   0xc   :  { %p200_p4 = pnand %p199_p3, %p193_p0 }
   0xe   :  { %181 = vmatpush3.bf16.msra.mxu0 %v178_v11 }
   0xf   :  { %183 = vmatprep.subr.bf16.mxu0 %v182_v14 }
  0x12   :  { %185 = vmatpush3.bf16.msra.mxu0 %v182_v14 }
  0x81   :  { %v18_v17 = vpop.permute.xlu0 %17 }
  0x82   :  { %vm22_vm1 = vcmp.eq.s32.totalorder %v18_v17, %v15_v16 }
  0x83   :  { %v137_v19 = vsel %vm22_vm1, 1.0, %v217_v18 }
  0x84   :  { %167 = vmatprep.mubr.msk.f32.mxu0 %vm36_vm0, %v137_v19 }
  0x85   :  { %v21_v20 = vpop.permute.xlu0 %20 }
  0x86   :  { %vm23_vm2 = vcmp.eq.s32.totalorder %v21_v20, %v15_v16 }
  0x87   :  { %v138_v21 = vsel %vm23_vm2, 1.0, %v217_v18 }
  0x88   :  { %168 = vmatmul.mubr.msk.f32.vlgmr.msra.gmra.mrb[0].mxu0 %vm36_vm0, %v138_v21 }
 0x15b   :  { %v169_v22 = vpop.f32.mrb[0].mxu0 }
 0x15c   :  { %120 = vst.msk [vmem:[#allocation2 + $0x8] sm:$0xff] %vm118_vm3, %v169_v22  ;;  %v109_v23 = vpop.f32.mrb[1].mxu0 }
 0x15d   :  { %119 = vst.msk [vmem:[#allocation2] sm:$0xff] %vm118_vm3, %v109_v23 }
 0x15e   :  { %203 = shalt.err (!%p200_p4)
}
 0x15f   :  { %s204_s4 = scalar_lea.hbm %s280_s2, 256 }
 0x160   :  { %p205_p5 = scmp.ne.s32.totalorder %s280_s2, %s204_s4  ;;  %p208_p6 = scmp.lt.u32.totalorder %s204_s4, %s280_s2 }
 0x162   :  { %p210_p7 = pnand %p208_p6, %p205_p5 }
 0x164   :  { %213 = shalt.err (!%p210_p7)
}
 0x165   :  { %s219_s9 = smov 128   ;;  %s220_s10 = smov 8  }
 0x166   :  { %132 = dma.vmem_to_hbm [thread:$0]  %s127_s1, 256, %s280_s2, [#allocation3], %s219_s9, %s219_s9, %s220_s10  }
 0x167   :  { %214 = dma.done.wait [#allocation3], 256  }
 0x168   :  { %215 = vsyncadd [#allocation3], 4294967040 }
 0x169   :  { %136 = vsyncpa [#allocation3], 1 }

</bundles_post_ra>
